<compile_context>
chip_gen: v5e
topology: v5e:2x2
jax: 0.10.0
libtpu: 0.0.40
codegen_flags: <defaults>
</compile_context>

<pallas_src>
import jax
import jax.numpy as jnp
from jax.experimental import pallas as pl
from jax.experimental.pallas import tpu as pltpu

D_IN = 784
H1 = 128
H2 = 64
H2_PAD = 128        # lane-dense hidden width for layers 2/3 (zero-padded, exact)
D_OUT = 10
D_OUT_PAD = 128     # lane-dense output slab; real logits live in columns [0, 10)
NEG_BIG = -1e30     # finite "-inf": padded logit columns -> exp() == 0 in softmax


def mlp_kernel(x_ref, w1_ref, b1_ref, w2_ref, b2_ref, w3_ref, b3_ref, o_ref):
    # In-kernel cast to bf16 (avoids a separate host-side pad/cast HBM pass).
    x = x_ref[...].astype(jnp.bfloat16)

    # Layer 1: Linear(784 -> 128) + ReLU.  bf16 MXU, f32 accumulate.
    h1 = jnp.dot(x, w1_ref[...], preferred_element_type=jnp.float32)
    h1 = jnp.maximum(h1 + b1_ref[...], 0.0)

    # Layer 2: Linear(128 -> 128 padded) + ReLU (padded cols have 0 weight/bias -> 0).
    h2 = jnp.dot(h1.astype(jnp.bfloat16), w2_ref[...],
                 preferred_element_type=jnp.float32)
    h2 = jnp.maximum(h2 + b2_ref[...], 0.0)

    # Layer 3: Linear(128 padded -> 128 padded); weight cols >= 10 are zero,
    # bias there is -1e30 so those columns vanish in the softmax.
    logits = jnp.dot(h2.astype(jnp.bfloat16), w3_ref[...],
                     preferred_element_type=jnp.float32)
    logits = logits + b3_ref[...]

    # Numerically stable softmax over the last axis (f32; exp on EUP).
    m = jnp.max(logits, axis=-1, keepdims=True)
    e = jnp.exp(logits - m)
    denom = jnp.sum(e, axis=-1, keepdims=True)
    o_ref[...] = (e * pl.reciprocal(denom, approx=True)).astype(o_ref.dtype)


def prepare_params(w1, b1, w2, b2, w3, b3):
    """One-time parameter prep (hoisted out of the per-call forward).

    Weights stored [in, out] (transposed vs torch's [out, in]); padded to
    lane-friendly shapes and cast to bf16.  Biases stay f32.
    """
    w1p = w1.astype(jnp.bfloat16)                                          # (784, 128)
    b1p = b1.astype(jnp.float32).reshape(1, H1)                            # (1, 128)
    w2p = jnp.zeros((H1, H2_PAD), jnp.bfloat16).at[:, :H2].set(
        w2.astype(jnp.bfloat16))                                           # (128, 128)
    b2p = jnp.zeros((1, H2_PAD), jnp.float32).at[0, :H2].set(
        b2.astype(jnp.float32))                                            # (1, 128)
    w3p = jnp.zeros((H2_PAD, D_OUT_PAD), jnp.bfloat16).at[:H2, :D_OUT].set(
        w3.astype(jnp.bfloat16))                                           # (128, 128)
    b3p = jnp.full((1, D_OUT_PAD), NEG_BIG, jnp.float32).at[0, :D_OUT].set(
        b3.astype(jnp.float32))                                            # (1, 128)
    return w1p, b1p, w2p, b2p, w3p, b3p


def mnetwork_forward(x, w1p, b1p, w2p, b2p, w3p, b3p, *, tile_b=None):
    """Forward pass of mNetwork.

    x: [B, 784] float32 (or bfloat16).  Prepared params from prepare_params().
    Returns softmax probabilities, [B, 10] float32.
    """
    B, d_in = x.shape
    assert d_in == D_IN

    if tile_b is None:
        # >=2 grid steps when possible (so v7x's 2 TensorCores both run via the
        # "parallel" axis), big tiles (up to 1024 rows) to amortize per-step
        # pipeline overhead on large batches.  Multiple of 16 for bf16 sublanes.
        tile_b = max(16, min(1024, ((pl.cdiv(B, 2) + 15) // 16) * 16))
    assert tile_b % 16 == 0, "tile_b must be a multiple of 16"

    # Partial last block handled by Pallas: OOB rows read garbage / are not
    # written back; softmax is purely row-wise so real rows are unaffected.
    grid = (pl.cdiv(B, tile_b),)

    flops = 2 * B * (D_IN * H1 + H1 * H2_PAD + H2_PAD * D_OUT_PAD)
    bytes_accessed = (
        x.size * x.dtype.itemsize
        + (w1p.size + w2p.size + w3p.size) * 2
        + (b1p.size + b2p.size + b3p.size) * 4
        + B * D_OUT_PAD * 2)
    cost = pl.CostEstimate(flops=flops, transcendentals=B * D_OUT_PAD,
                           bytes_accessed=bytes_accessed)

    out = pl.pallas_call(
        mlp_kernel,
        out_shape=jax.ShapeDtypeStruct((B, D_OUT_PAD), jnp.bfloat16),
        grid_spec=pltpu.PrefetchScalarGridSpec(
            num_scalar_prefetch=0,
            grid=grid,
            in_specs=[
                pl.BlockSpec((tile_b, D_IN), lambda i: (i, 0)),        # x tile (pipelined)
                pl.BlockSpec((D_IN, H1), lambda i: (0, 0)),            # W1 (resident)
                pl.BlockSpec((1, H1), lambda i: (0, 0)),               # b1
                pl.BlockSpec((H1, H2_PAD), lambda i: (0, 0)),          # W2 (col-padded)
                pl.BlockSpec((1, H2_PAD), lambda i: (0, 0)),           # b2
                pl.BlockSpec((H2_PAD, D_OUT_PAD), lambda i: (0, 0)),   # W3 (padded)
                pl.BlockSpec((1, D_OUT_PAD), lambda i: (0, 0)),        # b3 (-1e30 pad)
            ],
            out_specs=pl.BlockSpec((tile_b, D_OUT_PAD), lambda i: (i, 0)),
        ),
        compiler_params=pltpu.CompilerParams(
            dimension_semantics=("parallel",),       # megacore-shardable on v7x
            vmem_limit_bytes=32 * 1024 * 1024,
        ),
        cost_estimate=cost,
    )(x, w1p, b1p, w2p, b2p, w3p, b3p)

    # Kernel writes a lane-dense bf16 slab; the tiny [:, :10] slice + f32 cast
    # fuses with downstream consumers under jit.
    return out[:, :D_OUT].astype(jnp.float32)


def init_params(key):
    """Parameter init mirroring the PyTorch module.

    fc1: weight ~ N(0, 0.01), bias = 0.
    fc2/fc3: PyTorch default Linear init (uniform in +-1/sqrt(fan_in)).
    Weights stored as [in, out] (transposed vs torch's [out, in]).
    """
    k1, k2, k3, k4, k5 = jax.random.split(key, 5)
    w1 = 0.01 * jax.random.normal(k1, (D_IN, H1), dtype=jnp.float32)
    b1 = jnp.zeros((H1,), dtype=jnp.float32)

    bound2 = 1.0 / jnp.sqrt(128.0)
    w2 = jax.random.uniform(k2, (H1, H2), minval=-bound2, maxval=bound2, dtype=jnp.float32)
    b2 = jax.random.uniform(k3, (H2,), minval=-bound2, maxval=bound2, dtype=jnp.float32)

    bound3 = 1.0 / jnp.sqrt(64.0)
    w3 = jax.random.uniform(k4, (H2, D_OUT), minval=-bound3, maxval=bound3, dtype=jnp.float32)
    b3 = jax.random.uniform(k5, (D_OUT,), minval=-bound3, maxval=bound3, dtype=jnp.float32)
    return w1, b1, w2, b2, w3, b3


# TODO(synk): training utilities (CrossEntropyLoss, SGD step, fit loop) are not part
# of the forward pass and are intentionally not implemented as Pallas kernels.

if __name__ == "__main__":
    key = jax.random.PRNGKey(0)
    k_x, k_p = jax.random.split(key)

    B = 64  # default tile_b -> 32, grid = (2,): two pipelined (megacore-shardable) steps
    x = jax.random.normal(k_x, (B, D_IN), dtype=jnp.float32)

    raw = init_params(k_p)
    params = prepare_params(*raw)         # one-time prep, hoisted out of the forward

    fwd = jax.jit(mnetwork_forward)
    out = jax.block_until_ready(fwd(x, *params))

    assert out.shape == (B, D_OUT)
    assert bool(jnp.all(jnp.isfinite(out)))
    # softmax rows sum to ~1 (approx reciprocal + bf16 writeback -> small tolerance)
    assert jnp.allclose(jnp.sum(out, axis=1), 1.0, atol=1e-2)

    # reference check against plain f32 JAX (bf16 MXU streaming -> loosened tolerance)
    w1, b1, w2, b2, w3, b3 = raw

    def ref(x):
        h1 = jnp.maximum(x @ w1 + b1, 0.0)
        h2 = jnp.maximum(h1 @ w2 + b2, 0.0)
        return jax.nn.softmax(h2 @ w3 + b3, axis=1)

    assert jnp.allclose(out, ref(x), atol=2e-2)

    print("KERNEL_OK")
</pallas_src>

<mosaic_0001>
module attributes {stable_mosaic.version = 11 : i64} {
  func.func @mlp_kernel(%arg0: i32, %arg1: memref<32x784xf32, #tpu.memory_space<vmem>>, %arg2: memref<784x128xbf16, #tpu.memory_space<vmem>>, %arg3: memref<1x128xf32, #tpu.memory_space<vmem>>, %arg4: memref<128x128xbf16, #tpu.memory_space<vmem>>, %arg5: memref<1x128xf32, #tpu.memory_space<vmem>>, %arg6: memref<128x128xbf16, #tpu.memory_space<vmem>>, %arg7: memref<1x128xf32, #tpu.memory_space<vmem>>, %arg8: memref<32x128xbf16, #tpu.memory_space<vmem>>) attributes {dimension_semantics = [#tpu.dimension_semantics<parallel>], iteration_bounds = array<i64: 2>, scalar_prefetch = 0 : i64, scratch_operands = 0 : i64, tpu.core_type = #tpu.core_type<tc>, window_params = [{transform_indices = @transform_0, window_bounds = array<i64: 32, 784>}, {pipeline_mode = #tpu.pipeline_mode<synchronous>, transform_indices = @transform_1, window_bounds = array<i64: 784, 128>}, {pipeline_mode = #tpu.pipeline_mode<synchronous>, transform_indices = @transform_2, window_bounds = array<i64: 1, 128>}, {pipeline_mode = #tpu.pipeline_mode<synchronous>, transform_indices = @transform_3, window_bounds = array<i64: 128, 128>}, {pipeline_mode = #tpu.pipeline_mode<synchronous>, transform_indices = @transform_4, window_bounds = array<i64: 1, 128>}, {pipeline_mode = #tpu.pipeline_mode<synchronous>, transform_indices = @transform_5, window_bounds = array<i64: 128, 128>}, {pipeline_mode = #tpu.pipeline_mode<synchronous>, transform_indices = @transform_6, window_bounds = array<i64: 1, 128>}, {transform_indices = @transform_7, window_bounds = array<i64: 32, 128>}]} {
    %c0 = arith.constant 0 : index
    %c0_0 = arith.constant 0 : index
    %0 = vector.load %arg1[%c0, %c0_0] : memref<32x784xf32, #tpu.memory_space<vmem>>, vector<32x784xf32>
    %1 = arith.truncf %0 : vector<32x784xf32> to vector<32x784xbf16>
    %c0_1 = arith.constant 0 : index
    %c0_2 = arith.constant 0 : index
    %2 = vector.load %arg2[%c0_1, %c0_2] : memref<784x128xbf16, #tpu.memory_space<vmem>>, vector<784x128xbf16>
    %cst = arith.constant dense<0.000000e+00> : vector<32x128xf32>
    %3 = tpu.matmul %1, %2, %cst {dimension_numbers = #tpu.dot_dimension_numbers<[1], [0], [0], [1], [0, 0, 1, 1], [], []>} : vector<32x784xbf16>, vector<784x128xbf16>, vector<32x128xf32> -> vector<32x128xf32>
    %c0_3 = arith.constant 0 : index
    %c0_4 = arith.constant 0 : index
    %4 = vector.load %arg3[%c0_3, %c0_4] : memref<1x128xf32, #tpu.memory_space<vmem>>, vector<1x128xf32>
    %5 = vector.broadcast %4 : vector<1x128xf32> to vector<32x128xf32>
    %6 = arith.addf %3, %5 : vector<32x128xf32>
    %cst_5 = arith.constant 0.000000e+00 : f32
    %7 = vector.broadcast %cst_5 : f32 to vector<32x128xf32>
    %8 = arith.maximumf %6, %7 : vector<32x128xf32>
    %9 = arith.truncf %8 : vector<32x128xf32> to vector<32x128xbf16>
    %c0_6 = arith.constant 0 : index
    %c0_7 = arith.constant 0 : index
    %10 = vector.load %arg4[%c0_6, %c0_7] : memref<128x128xbf16, #tpu.memory_space<vmem>>, vector<128x128xbf16>
    %cst_8 = arith.constant dense<0.000000e+00> : vector<32x128xf32>
    %11 = tpu.matmul %9, %10, %cst_8 {dimension_numbers = #tpu.dot_dimension_numbers<[1], [0], [0], [1], [0, 0, 1, 1], [], []>} : vector<32x128xbf16>, vector<128x128xbf16>, vector<32x128xf32> -> vector<32x128xf32>
    %c0_9 = arith.constant 0 : index
    %c0_10 = arith.constant 0 : index
    %12 = vector.load %arg5[%c0_9, %c0_10] : memref<1x128xf32, #tpu.memory_space<vmem>>, vector<1x128xf32>
    %13 = vector.broadcast %12 : vector<1x128xf32> to vector<32x128xf32>
    %14 = arith.addf %11, %13 : vector<32x128xf32>
    %cst_11 = arith.constant 0.000000e+00 : f32
    %15 = vector.broadcast %cst_11 : f32 to vector<32x128xf32>
    %16 = arith.maximumf %14, %15 : vector<32x128xf32>
    %17 = arith.truncf %16 : vector<32x128xf32> to vector<32x128xbf16>
    %c0_12 = arith.constant 0 : index
    %c0_13 = arith.constant 0 : index
    %18 = vector.load %arg6[%c0_12, %c0_13] : memref<128x128xbf16, #tpu.memory_space<vmem>>, vector<128x128xbf16>
    %cst_14 = arith.constant dense<0.000000e+00> : vector<32x128xf32>
    %19 = tpu.matmul %17, %18, %cst_14 {dimension_numbers = #tpu.dot_dimension_numbers<[1], [0], [0], [1], [0, 0, 1, 1], [], []>} : vector<32x128xbf16>, vector<128x128xbf16>, vector<32x128xf32> -> vector<32x128xf32>
    %c0_15 = arith.constant 0 : index
    %c0_16 = arith.constant 0 : index
    %20 = vector.load %arg7[%c0_15, %c0_16] : memref<1x128xf32, #tpu.memory_space<vmem>>, vector<1x128xf32>
    %21 = vector.broadcast %20 : vector<1x128xf32> to vector<32x128xf32>
    %22 = arith.addf %19, %21 : vector<32x128xf32>
    %cst_17 = arith.constant dense<0xFF800000> : vector<32xf32>
    %23 = vector.multi_reduction <maximumf>, %22, %cst_17 [1] : vector<32x128xf32> to vector<32xf32>
    %24 = vector.shape_cast %23 : vector<32xf32> to vector<32x1xf32>
    %25 = vector.broadcast %24 : vector<32x1xf32> to vector<32x128xf32>
    %26 = arith.subf %22, %25 : vector<32x128xf32>
    %27 = math.exp %26 : vector<32x128xf32>
    %cst_18 = arith.constant dense<0.000000e+00> : vector<32xf32>
    %28 = vector.multi_reduction <add>, %27, %cst_18 [1] : vector<32x128xf32> to vector<32xf32>
    %29 = vector.shape_cast %28 : vector<32xf32> to vector<32x1xf32>
    %30 = tpu.reciprocal %29 {approx = true} : vector<32x1xf32> -> vector<32x1xf32>
    %31 = vector.broadcast %30 : vector<32x1xf32> to vector<32x128xf32>
    %32 = arith.mulf %27, %31 : vector<32x128xf32>
    %33 = arith.truncf %32 : vector<32x128xf32> to vector<32x128xbf16>
    %c0_19 = arith.constant 0 : index
    %c0_20 = arith.constant 0 : index
    %34 = vector.load %arg8[%c0_19, %c0_20] : memref<32x128xbf16, #tpu.memory_space<vmem>>, vector<32x128xbf16>
    tpu.vector_store %arg8[%c0_19, %c0_20], %33 {strides = array<i32>} : memref<32x128xbf16, #tpu.memory_space<vmem>>, vector<32x128xbf16>,
    return
  }
  func.func @transform_0(%arg0: i32) -> (i32, i32) {
    %c0_i32 = arith.constant 0 : i32
    %c0_i32_0 = arith.constant 0 : i32
    return %arg0, %c0_i32 : i32, i32
  }
  func.func @transform_1(%arg0: i32) -> (i32, i32) {
    %c0_i32 = arith.constant 0 : i32
    %c0_i32_0 = arith.constant 0 : i32
    %c0_i32_1 = arith.constant 0 : i32
    return %c0_i32, %c0_i32_0 : i32, i32
  }
  func.func @transform_2(%arg0: i32) -> (i32, i32) {
    %c0_i32 = arith.constant 0 : i32
    %c0_i32_0 = arith.constant 0 : i32
    %c0_i32_1 = arith.constant 0 : i32
    return %c0_i32, %c0_i32_0 : i32, i32
  }
  func.func @transform_3(%arg0: i32) -> (i32, i32) {
    %c0_i32 = arith.constant 0 : i32
    %c0_i32_0 = arith.constant 0 : i32
    %c0_i32_1 = arith.constant 0 : i32
    return %c0_i32, %c0_i32_0 : i32, i32
  }
  func.func @transform_4(%arg0: i32) -> (i32, i32) {
    %c0_i32 = arith.constant 0 : i32
    %c0_i32_0 = arith.constant 0 : i32
    %c0_i32_1 = arith.constant 0 : i32
    return %c0_i32, %c0_i32_0 : i32, i32
  }
  func.func @transform_5(%arg0: i32) -> (i32, i32) {
    %c0_i32 = arith.constant 0 : i32
    %c0_i32_0 = arith.constant 0 : i32
    %c0_i32_1 = arith.constant 0 : i32
    return %c0_i32, %c0_i32_0 : i32, i32
  }
  func.func @transform_6(%arg0: i32) -> (i32, i32) {
    %c0_i32 = arith.constant 0 : i32
    %c0_i32_0 = arith.constant 0 : i32
    %c0_i32_1 = arith.constant 0 : i32
    return %c0_i32, %c0_i32_0 : i32, i32
  }
  func.func @transform_7(%arg0: i32) -> (i32, i32) {
    %c0_i32 = arith.constant 0 : i32
    %c0_i32_0 = arith.constant 0 : i32
    return %arg0, %c0_i32 : i32, i32
  }
}

</mosaic_0001>

<bundles_post_ra>
// kernel: mnetwork_forward.1
= control target key start
LH: loop header
LB: loop body
LE: loop exit
PB: predicated region body
PF: predicated region fallthrough
CT: control target
= control target key end

     0   :  { %12 = vsyncpa [#allocation3], 0  ;;  %s2095_s0 = inlined_call_operand.hbm [shape: f32[64,784], index: 0, kind: input, shape index: {}]   ;;  %s2096_s1 = inlined_call_operand.hbm [shape: bf16[784,128], index: 1, kind: input, shape index: {}]   ;;  %s2097_s2 = inlined_call_operand.vmem [shape: f32[1,128], index: 2, kind: input, shape index: {}]   ;;  %s2098_s3 = inlined_call_operand.hbm [shape: bf16[128,128], index: 3, kind: input, shape index: {}]   ;;  %s2099_s4 = inlined_call_operand.vmem [shape: f32[1,128], index: 4, kind: input, shape index: {}]   ;;  %s2100_s5 = inlined_call_operand.hbm [shape: bf16[128,128], index: 5, kind: input, shape index: {}]   ;;  %s2101_s6 = inlined_call_operand.vmem [shape: f32[1,128], index: 6, kind: input, shape index: {}]   ;;  %s2102_s7 = inlined_call_operand.vmem [shape: bf16[64,128], index: 7, kind: output, shape index: {}]  }
   0x1   :  { %14 = vsyncpa [#allocation3 + $0x1], 0 }
   0x2   :  { %15 = vsyncpa [#allocation5], 0 }
   0x3   :  { %16 = vsyncpa [#allocation8], 0  ;;  %s1930_s24 = smov 0   ;;  %s1932_s25 = smov 0  }
   0x4   :  { %s1934_s26 = smov 0   ;;  %s1936_s27 = smov 0  }
   0x5 LB: > { %s2103_s28 = sadd.s32 4294967295, %s1881_s27   ;;  %p42_p0 = scmp.ne.s32.totalorder %s1873_s25, %s1869_s24  ;;  %s1881_s27 = sphi %s1936_s27, %s2113_s27   ;;  %s1877_s26 = sphi %s1934_s26, %s2112_s26   ;;  %s1873_s25 = sphi %s1932_s25, %s2111_s25   ;;  %s1869_s24 = sphi %s1930_s24, %s2110_s24  }
   0x6   : > { %p1952_p1 = scmp.eq.s32.totalorder %s2103_s28, 0  ;;  %p1261_p2 = scmp.ge.s32.totalorder %s1881_s27, 1 }
   0x7   : > { %p205_p3 = scmp.lt.s32.totalorder %s1881_s27, 3  ;;  %s216_s10 = sshll.u32 %s2096_s1, 4  ;;  %s217_s10 = int_to_ptr.hbm [resolvable:$true] %s216_s10 }
   0x8   : > { %p1960_p4 = por %p1952_p1, %p42_p0  ;;  %s1883_s12 = smov [#allocation4]  }
   0x9   : > { %p1967_p5 = pnand %p1261_p2, %p205_p3  ;;  %s218_s13 = sshll.u32 %s1883_s12, 4  ;;  %s219_s13 = int_to_ptr.vmem [resolvable:$true] %s218_s13 }
   0xa   : > { %s233_s17 = sshll.u32 %s2098_s3, 4  ;;  %s1884_s18 = smov 64   ;;  %s234_s17 = int_to_ptr.hbm [resolvable:$true] %s233_s17 }
   0xb   : > { %p1640_p6 = pneg %p1967_p5  ;;  %s1885_s19 = smov 4  }
   0xc   : > { %s1886_s20 = smov [#allocation6]   ;;  %s250_s24 = sshll.u32 %s2100_s5, 4  ;;  %s251_s24 = int_to_ptr.hbm [resolvable:$true] %s250_s24 }
   0xd   : > { %p1975_p7 = pnand %p1640_p6, %p1952_p1  ;;  %s235_s21 = sshll.u32 %s1886_s20, 4  ;;  %s236_s21 = int_to_ptr.vmem [resolvable:$true] %s235_s21 }
   0xe   : > { %s1887_s8 = smov [#allocation7]   ;;  %s1990_s12 = sadd.s32 1, %s1881_s27  }
   0xf   : > { %1643 = dma.hbm_to_vmem [thread:$0]  (!%p1975_p7), %s217_s10, 6272, %s219_s13, [#allocation5], %s1884_s18, %s1884_s18, %s1885_s19  }
  0x10   : > { %1646 = dma.hbm_to_vmem [thread:$0]  (!%p1975_p7), %s234_s17, 1024, %s236_s21, [#allocation5], %s1884_s18, %s1884_s18, %s1885_s19  }
  0x11   : > { %s252_s9 = sshll.u32 %s1887_s8, 4  ;;  %s26_s10 = ssub.s32 %s1881_s27, %s1990_s12  ;;  %s253_s9 = int_to_ptr.vmem [resolvable:$true] %s252_s9 }
  0x12   : > { %1649 = dma.hbm_to_vmem [thread:$0]  (!%p1975_p7), %s251_s24, 1024, %s253_s9, [#allocation8], %s1884_s18, %s1884_s18, %s1885_s19  }
  0x13   : > { %s29_s13 = sadd.s32 1, %s1877_s26  ;;  %p27_p8 = scmp.eq.s32.totalorder %s26_s10, 0 }
  0x14   : > { %p36_p9 = scmp.ne.s32.totalorder %s1877_s26, %s1873_s25  ;;  %p37_p10 = scmp.eq.s32.totalorder %s1881_s27, 0 }
  0x15   : > { %p1657_p11 = scmp.lt.s32.totalorder %s1881_s27, 2  ;;  %s269_s16 = sand.u32 1, %s1877_s26  }
  0x16   : > { %s2002_s15 = scalar_select %p27_p8, %s1877_s26, %s29_s13  }
  0x17   : > { %p38_p12 = por %p37_p10, %p36_p9  ;;  %s1623_s17 = smul.u32 224, %s269_s16 }
  0x18   : > { %s1624_s20 = smul.u32 224, %s1881_s27  ;;  %s270_s8 = scalar_lea.sflag [#allocation3], %s269_s16 }
  0x19   : > { %p2006_p13 = pnand %p1657_p11, %p38_p12  ;;  %s273_s19 = scalar_lea.vmem [#allocation2], %s1623_s17 }
  0x1a   : > { %s279_s18 = scalar_lea.hbm %s2095_s0, %s1624_s20  ;;  %s282_s23 = sshll.u32 %s273_s19, 4  ;;  %s283_s23 = int_to_ptr.vmem [resolvable:$true] %s282_s23 }
  0x1b   : > { %s280_s24 = sshll.u32 %s279_s18, 4  ;;  %p1813_p2 = pneg %p2006_p13  ;;  %s281_s24 = int_to_ptr.hbm [resolvable:$true] %s280_s24 }
  0x1c   : > { %s1809_s9 = sshra.s32 %s281_s24, 4  ;;  %s1816_s22 = scalar_lea.hbm %s2095_s0, 448  ;;  %s1810_s9 = int_to_ptr.hbm [resolvable:$true] %s1809_s9 }
  0x1d   : > { %s1811_s10 = scalar_lea.hbm %s1810_s9, 224  ;;  %p1817_p7 = scmp.lt.s32.totalorder %s1810_s9, %s2095_s0 }
  0x1e   : > { %p1812_p0 = scmp.ne.s32.totalorder %s1810_s9, %s1811_s10  ;;  %p1818_p8 = scmp.lt.s32.totalorder %s1816_s22, %s1811_s10 }
  0x20   : > { %p1814_p3 = pnand %p1813_p2, %p1812_p0  ;;  %p1819_p9 = por %p1818_p8, %p1817_p7 }
  0x22   : > { %p1815_p6 = pneg %p1814_p3 }
  0x24   : > { %p1820_p10 = pnand %p1819_p9, %p1815_p6 }
  0x26   : > { %1823 = shalt.err (!%p1820_p10)
}
  0x27   : > { %s1888_s16 = smov 896   ;;  %s1889_s17 = smov 56  }
  0x28   : > { %1653 = dma.hbm_to_vmem [thread:$0]  (!%p2006_p13), %s281_s24, 3584, %s283_s23, %s270_s8, %s1888_s16, %s1888_s16, %s1889_s17  }
  0x29   : > { %294 = sbr.rel (%p1967_p5) target bundleno = 816 (0x330), region = 48  ;;  %s296_s28 = sand.u32 (!%p1967_p5), 1, %s1873_s25  }
  0x2a   : > { %s1625_s18 = smul.u32 (!%p1967_p5), 224, %s296_s28  ;;  %s297_s19 = scalar_lea.sflag (!%p1967_p5), [#allocation3], %s296_s28 }
  0x2c   : > { %s2026_s13 = scalar_lea.vmem (!%p1967_p5), [#allocation2], %s1625_s18 }
  0x2e   : > { %1856 = dma.done.wait (%p1960_p4), %s297_s19, 3584  }
  0x2f   : > { %1858 = vsyncadd (%p1960_p4), %s297_s19, 4294963712 }
  0x30   : > { %1860 = dma.done.wait (%p1952_p1), [#allocation5], 7296  }
  0x31   : > { %1862 = vsyncadd (%p1952_p1), [#allocation5], 4294960000 }
  0x32   : > { %1864 = dma.done.wait (%p1952_p1), [#allocation8], 1024  }
  0x33   : > { %1866 = vsyncadd (%p1952_p1), [#allocation8], 4294966272  ;;  %v1546_v0 = vld [vmem:[#allocation4 + $0x38] sm:$0xff]  ;;  %v1545_v4 = vld [vmem:[#allocation4 + $0x30] sm:$0xff]  ;;  %vm793_vm0 = vcmask 130048   ;;  %s2109_s8 = sadd.s32 4294967295, %s1881_s27  }
  0x34   : > { %v1554_v1 = vld [vmem:[#allocation4 + $0x78] sm:$0xff]  ;;  %800 = vmatpush.bf16.msra.mxu0 %v1546_v0  ;;  %v1553_v5 = vld [vmem:[#allocation4 + $0x70] sm:$0xff]  ;;  %v1544_v8 = vld [vmem:[#allocation4 + $0x28] sm:$0xff]  ;;  %s1273_s9 = sshll.u32 %s2109_s8, 2 }
  0x35   : > { %v1562_v2 = vld [vmem:[#allocation4 + $0xb8] sm:$0xff]  ;;  %819 = vmatpush.bf16.msra.mxu1 %v1554_v1  ;;  %v1561_v6 = vld [vmem:[#allocation4 + $0xb0] sm:$0xff]  ;;  %v1552_v9 = vld [vmem:[#allocation4 + $0x68] sm:$0xff]  ;;  %p349_p1 = scmp.lt.s32.totalorder %s1273_s9, 7 }
  0x36   : > { %v1570_v3 = vld [vmem:[#allocation4 + $0xf8] sm:$0xff]  ;;  %838 = vmatpush.bf16.msra.mxu2 %v1562_v2  ;;  %v1569_v7 = vld [vmem:[#allocation4 + $0xf0] sm:$0xff]  ;;  %v1560_v10 = vld [vmem:[#allocation4 + $0xa8] sm:$0xff] }
  0x37   : > { %857 = vmatpush.bf16.msra.mxu3 %v1570_v3  ;;  %v1568_v11 = vld [vmem:[#allocation4 + $0xe8] sm:$0xff]  ;;  %v1543_v12 = vld [vmem:[#allocation4 + $0x20] sm:$0xff]  ;;  %v1542_v16 = vld [vmem:[#allocation4 + $0x18] sm:$0xff]  ;;  %s2115_s9 = smov (!%p349_p1, %s1273_s9), 7 }
  0x38   : > { %801 = vmatpush.bf16.msra.mxu0 %v1545_v4  ;;  %v1551_v13 = vld [vmem:[#allocation4 + $0x60] sm:$0xff]  ;;  %v1550_v17 = vld [vmem:[#allocation4 + $0x58] sm:$0xff]  ;;  %v1541_v20 = vld [vmem:[#allocation4 + $0x10] sm:$0xff]  ;;  %s1274_s10 = sshll.u32 %s2115_s9, 2 }
  0x39   : > { %820 = vmatpush.bf16.msra.mxu1 %v1553_v5  ;;  %v1559_v14 = vld [vmem:[#allocation4 + $0xa0] sm:$0xff]  ;;  %v1558_v18 = vld [vmem:[#allocation4 + $0x98] sm:$0xff]  ;;  %v1549_v21 = vld [vmem:[#allocation4 + $0x50] sm:$0xff]  ;;  %s352_s20 = scalar_lea.vmem %s2102_s7, %s1274_s10 }
  0x3a   : > { %839 = vmatpush.bf16.msra.mxu2 %v1561_v6  ;;  %v1567_v15 = vld [vmem:[#allocation4 + $0xe0] sm:$0xff]  ;;  %v1566_v19 = vld [vmem:[#allocation4 + $0xd8] sm:$0xff]  ;;  %v1557_v22 = vld [vmem:[#allocation4 + $0x90] sm:$0xff] }
  0x3b   : > { %858 = vmatpush.bf16.msra.mxu3 %v1569_v7  ;;  %v1565_v23 = vld [vmem:[#allocation4 + $0xd0] sm:$0xff]  ;;  %v1540_v24 = vld [vmem:[#allocation4 + $0x8] sm:$0xff]  ;;  %v1539_v28 = vld [vmem:[#allocation4] sm:$0xff] }
  0x3c   : > { %802 = vmatpush.bf16.msra.mxu0 %v1544_v8  ;;  %v1548_v25 = vld [vmem:[#allocation4 + $0x48] sm:$0xff]  ;;  %v1547_v29 = vld [vmem:[#allocation4 + $0x40] sm:$0xff]  ;;  %v362_v33 = vld [vmem:[%s2026_s13 + $0x38] sm:$0xff] }
  0x3d   : > { %821 = vmatpush.bf16.msra.mxu1 %v1552_v9  ;;  %v1556_v26 = vld [vmem:[#allocation4 + $0x88] sm:$0xff]  ;;  %v1555_v30 = vld [vmem:[#allocation4 + $0x80] sm:$0xff]  ;;  %v357_v36 = vld [vmem:[%s2026_s13 + $0x10] sm:$0xff] }
  0x3e   : > { %840 = vmatpush.bf16.msra.mxu2 %v1560_v10  ;;  %v1564_v27 = vld [vmem:[#allocation4 + $0xc8] sm:$0xff]  ;;  %v1563_v31 = vld [vmem:[#allocation4 + $0xc0] sm:$0xff]  ;;  %v1578_v39 = vld [vmem:[#allocation4 + $0x138] sm:$0xff] }
  0x3f   : > { %859 = vmatpush.bf16.msra.mxu3 %v1568_v11  ;;  %v355_v32 = vld [vmem:[%s2026_s13] sm:$0xff]  ;;  %v356_v34 = vld [vmem:[%s2026_s13 + $0x8] sm:$0xff]  ;;  %v358_v40 = vld [vmem:[%s2026_s13 + $0x18] sm:$0xff] }
  0x40   : > { %803 = vmatpush.bf16.msra.mxu0 %v1543_v12  ;;  %v363_v35 = vld [vmem:[%s2026_s13 + $0x40] sm:$0xff]  ;;  %v364_v37 = vld [vmem:[%s2026_s13 + $0x48] sm:$0xff]  ;;  %v365_v41 = vld [vmem:[%s2026_s13 + $0x50] sm:$0xff]  ;;  %v383_v42 = vpack.c.bf16 %v362_v33, %v355_v32 }
  0x41   : > { %822 = vmatpush.bf16.msra.mxu1 %v1551_v13  ;;  %v1587_v38 = vld [vmem:[#allocation4 + $0x180] sm:$0xff]  ;;  %v384_v43 = vpack.c.bf16 %v363_v35, %v356_v34  ;;  %v385_v44 = vpack.c.bf16 %v364_v37, %v357_v36  ;;  %v1586_v45 = vld [vmem:[#allocation4 + $0x178] sm:$0xff]  ;;  %v386_v46 = vpack.c.bf16 %v365_v41, %v358_v40  ;;  %v1577_v47 = vld [vmem:[#allocation4 + $0x130] sm:$0xff] }
  0x42   : > { %841 = vmatpush.bf16.msra.mxu2 %v1559_v14  ;;  %v1585_v48 = vld [vmem:[#allocation4 + $0x170] sm:$0xff]  ;;  %v1576_v49 = vld [vmem:[#allocation4 + $0x128] sm:$0xff]  ;;  %v1575_v51 = vld [vmem:[#allocation4 + $0x120] sm:$0xff] }
  0x43   : > { %860 = vmatpush.bf16.msra.mxu3 %v1567_v15  ;;  %v1584_v50 = vld [vmem:[#allocation4 + $0x168] sm:$0xff]  ;;  %v1583_v52 = vld [vmem:[#allocation4 + $0x160] sm:$0xff]  ;;  %v369_v53 = vld [vmem:[%s2026_s13 + $0x70] sm:$0xff] }
  0x44   : > { %804 = vmatpush.bf16.msra.mxu0 %v1542_v16  ;;  %v376_v54 = vld [vmem:[%s2026_s13 + $0xa8] sm:$0xff]  ;;  %v370_v55 = vld [vmem:[%s2026_s13 + $0x78] sm:$0xff]  ;;  %v377_v56 = vld [vmem:[%s2026_s13 + $0xb0] sm:$0xff] }
  0x45   : > { %823 = vmatpush.bf16.msra.mxu1 %v1550_v17  ;;  %v371_v57 = vld [vmem:[%s2026_s13 + $0x80] sm:$0xff]  ;;  %v378_v58 = vld [vmem:[%s2026_s13 + $0xb8] sm:$0xff]  ;;  %v372_v60 = vld [vmem:[%s2026_s13 + $0x88] sm:$0xff]  ;;  %v390_v62 = vpack.c.bf16 %v376_v54, %v369_v53  ;;  %v391_v63 = vpack.c.bf16 %v377_v56, %v370_v55 }
  0x46   : > { %842 = vmatpush.bf16.msra.mxu2 %v1558_v18  ;;  %v1574_v59 = vld [vmem:[#allocation4 + $0x118] sm:$0xff]  ;;  %v379_v61 = vld [vmem:[%s2026_s13 + $0xc0] sm:$0xff]  ;;  %v392_v0 = vpack.c.bf16 %v378_v58, %v371_v57  ;;  %v1573_v3 = vld [vmem:[#allocation4 + $0x110] sm:$0xff] }
  0x47   : > { %861 = vmatpush.bf16.msra.mxu3 %v1566_v19  ;;  %v1582_v1 = vld [vmem:[#allocation4 + $0x158] sm:$0xff]  ;;  %v393_v2 = vpack.c.bf16 %v379_v61, %v372_v60  ;;  %v1581_v4 = vld [vmem:[#allocation4 + $0x150] sm:$0xff]  ;;  %v1572_v5 = vld [vmem:[#allocation4 + $0x108] sm:$0xff] }
  0x48   : > { %805 = vmatpush.bf16.msra.mxu0 %v1541_v20  ;;  %v1580_v6 = vld [vmem:[#allocation4 + $0x148] sm:$0xff]  ;;  %v1571_v7 = vld [vmem:[#allocation4 + $0x100] sm:$0xff]  ;;  %v366_v10 = vld [vmem:[%s2026_s13 + $0x58] sm:$0xff] }
  0x49   : > { %824 = vmatpush.bf16.msra.mxu1 %v1549_v21  ;;  %v1579_v8 = vld [vmem:[#allocation4 + $0x140] sm:$0xff]  ;;  %v360_v11 = vld [vmem:[%s2026_s13 + $0x28] sm:$0xff]  ;;  %v361_v13 = vld [vmem:[%s2026_s13 + $0x30] sm:$0xff] }
  0x4a   : > { %843 = vmatpush.bf16.msra.mxu2 %v1557_v22  ;;  %v359_v9 = vld [vmem:[%s2026_s13 + $0x20] sm:$0xff]  ;;  %v368_v14 = vld [vmem:[%s2026_s13 + $0x68] sm:$0xff]  ;;  %v373_v18 = vld [vmem:[%s2026_s13 + $0x90] sm:$0xff] }
  0x4b   : > { %862 = vmatpush.bf16.msra.mxu3 %v1565_v23  ;;  %v367_v12 = vld [vmem:[%s2026_s13 + $0x60] sm:$0xff]  ;;  %v387_v15 = vpack.c.bf16 %v366_v10, %v359_v9  ;;  %v389_v17 = vpack.c.bf16 %v368_v14, %v361_v13  ;;  %v380_v19 = vld [vmem:[%s2026_s13 + $0xc8] sm:$0xff]  ;;  %v374_v20 = vld [vmem:[%s2026_s13 + $0x98] sm:$0xff] }
  0x4c   : > { %806 = vmatpush.bf16.msra.mxu0 %v1540_v24  ;;  %v388_v16 = vpack.c.bf16 %v367_v12, %v360_v11  ;;  %v381_v21 = vld [vmem:[%s2026_s13 + $0xd0] sm:$0xff]  ;;  %v375_v22 = vld [vmem:[%s2026_s13 + $0xa0] sm:$0xff]  ;;  %v382_v23 = vld [vmem:[%s2026_s13 + $0xd8] sm:$0xff]  ;;  %v394_v24 = vpack.c.bf16 %v380_v19, %v373_v18 }
  0x4d   : > { %825 = vmatpush.bf16.msra.mxu1 %v1548_v25  ;;  %v395_v25 = vpack.c.bf16 %v381_v21, %v374_v20  ;;  %v1592_v32 = vld [vmem:[#allocation6 + $0x20] sm:$0xff]  ;;  %v1591_v33 = vld [vmem:[#allocation6 + $0x18] sm:$0xff]  ;;  %v1590_v37 = vld [vmem:[#allocation6 + $0x10] sm:$0xff] }
  0x4e   : > { %844 = vmatpush.bf16.msra.mxu2 %v1556_v26  ;;  %v396_v26 = vpack.c.bf16 %v382_v23, %v375_v22  ;;  %v1600_v14 = vld [vmem:[#allocation7 + $0x20] sm:$0xff] }
  0x4f   : > { %863 = vmatpush.bf16.msra.mxu3 %v1564_v27  ;;  %v1595_v27 = vld [vmem:[#allocation6 + $0x38] sm:$0xff] }
  0x50   : > { %807 = vmatpush.bf16.msra.mxu0 %v1539_v28  ;;  %v1594_v28 = vld [vmem:[#allocation6 + $0x30] sm:$0xff] }
  0x51   : > { %826 = vmatpush.bf16.msra.mxu1 %v1547_v29  ;;  %v1593_v29 = vld [vmem:[#allocation6 + $0x28] sm:$0xff] }
  0x52   : > { %845 = vmatpush.bf16.msra.mxu2 %v1555_v30 }
  0x53   : > { %864 = vmatpush.bf16.msra.mxu3 %v1563_v31  ;;  %808 = vmatmul.bf16.vlgmr.msra.gmra.mxu0 %v383_v42  ;;  %v1588_v42 = vld [vmem:[#allocation6] sm:$0xff] }
  0x54   : > { %876 = vmatpush.bf16.msrb.mxu0 %v1578_v39  ;;  %827 = vmatmul.bf16.vlgmr.msra.gmra.mxu1 %v384_v43  ;;  %v1700_v43 = vld [vmem:[%s2097_s2] ss:$0 sm:$0xff] }
  0x55   : > { %846 = vmatmul.bf16.vlgmr.msra.gmra.mxu2 %v385_v44  ;;  %895 = vmatpush.bf16.msrb.mxu1 %v1586_v45 }
  0x56   : > { %921 = vmatpush.bf16.msrb.mxu2 %v1587_v38  ;;  %865 = vmatmul.bf16.vlgmr.msra.gmra.mxu3 %v386_v46  ;;  %v1589_v38 = vld [vmem:[#allocation6 + $0x8] sm:$0xff] }
  0x57   : > { %1007 = vmatpush.bf16.msrb.mxu3 %v1595_v27 }
  0x58   : > { %877 = vmatpush.bf16.msrb.mxu0 %v1577_v47 }
  0x59   : > { %896 = vmatpush.bf16.msrb.mxu1 %v1585_v48 }
  0x5b   : > { %1008 = vmatpush.bf16.msrb.mxu3 %v1594_v28 }
  0x5c   : > { %878 = vmatpush.bf16.msrb.mxu0 %v1576_v49 }
  0x5d   : > { %897 = vmatpush.bf16.msrb.mxu1 %v1584_v50 }
  0x5f   : > { %1009 = vmatpush.bf16.msrb.mxu3 %v1593_v29 }
  0x60   : > { %879 = vmatpush.bf16.msrb.mxu0 %v1575_v51 }
  0x61   : > { %898 = vmatpush.bf16.msrb.mxu1 %v1583_v52 }
  0x63   : > { %813 = vmatmul.bf16.gmra.mxu0 %v390_v62  ;;  %1010 = vmatpush.bf16.msrb.mxu3 %v1592_v32 }
  0x64   : > { %880 = vmatpush.bf16.msrb.mxu0 %v1574_v59  ;;  %832 = vmatmul.bf16.gmra.mxu1 %v391_v63  ;;  %v1603_v59 = vld [vmem:[#allocation7 + $0x38] sm:$0xff] }
  0x65   : > { %851 = vmatmul.bf16.gmra.mxu2 %v392_v0  ;;  %899 = vmatpush.bf16.msrb.mxu1 %v1582_v1  ;;  %v1602_v0 = vld [vmem:[#allocation7 + $0x30] sm:$0xff] }
  0x66   : > { %870 = vmatmul.bf16.gmra.mxu3 %v393_v2 }
  0x67   : > { %1011 = vmatpush.bf16.msrb.mxu3 %v1591_v33 }
  0x68   : > { %881 = vmatpush.bf16.msrb.mxu0 %v1573_v3 }
  0x69   : > { %900 = vmatpush.bf16.msrb.mxu1 %v1581_v4 }
  0x6b   : > { %1012 = vmatpush.bf16.msrb.mxu3 %v1590_v37 }
  0x6c   : > { %882 = vmatpush.bf16.msrb.mxu0 %v1572_v5 }
  0x6d   : > { %901 = vmatpush.bf16.msrb.mxu1 %v1580_v6  ;;  %v1601_v6 = vld [vmem:[#allocation7 + $0x28] sm:$0xff] }
  0x6f   : > { %1013 = vmatpush.bf16.msrb.mxu3 %v1589_v38  ;;  %v1599_v38 = vld [vmem:[#allocation7 + $0x18] sm:$0xff] }
  0x70   : > { %883 = vmatpush.bf16.msrb.mxu0 %v1571_v7 }
  0x71   : > { %902 = vmatpush.bf16.msrb.mxu1 %v1579_v8 }
  0x73   : > { %884 = vmatmul.bf16.vlgmr.msrb.gmra.mxu0 %v387_v15  ;;  %1014 = vmatpush.bf16.msrb.mxu3 %v1588_v42 }
  0x74   : > { %903 = vmatmul.bf16.vlgmr.msrb.gmra.mxu1 %v388_v16  ;;  %1100 = vmatpush.bf16.msra.mxu0 %v1603_v59 }
  0x75   : > { %1471 = vmatmul.msk.bf16.vlgmr.msrb.gmra.mxu2 %vm793_vm0, %v389_v17  ;;  %1615 = vmatpush.bf16.msra.mxu1 %v1603_v59 }
  0x78   : > { %1101 = vmatpush.bf16.msra.mxu0 %v1602_v0 }
  0x79   : > { %1616 = vmatpush.bf16.msra.mxu1 %v1602_v0 }
  0x7c   : > { %1102 = vmatpush.bf16.msra.mxu0 %v1601_v6 }
  0x7d   : > { %1617 = vmatpush.bf16.msra.mxu1 %v1601_v6 }
  0x80   : > { %1103 = vmatpush.bf16.msra.mxu0 %v1600_v14 }
  0x81   : > { %1618 = vmatpush.bf16.msra.mxu1 %v1600_v14 }
  0x83   : > { %889 = vmatmul.bf16.gmra.mxu0 %v394_v24 }
  0x84   : > { %908 = vmatmul.bf16.gmra.mxu1 %v395_v25  ;;  %1104 = vmatpush.bf16.msra.mxu0 %v1599_v38 }
  0x85   : > { %1472 = vmatmul.msk.bf16.gmra.mxu2 %vm793_vm0, %v396_v26  ;;  %1619 = vmatpush.bf16.msra.mxu1 %v1599_v38 }
  0xd0   : > { %v809_v30 = vpop.f32.mrf.mxu0 }
  0xd1   : > { %v828_v31 = vpop.f32.mrf.mxu1  ;;  %v810_v48 = vadd.f32 %v1700_v43, %v809_v30 }
  0xd3   : > { %v829_v49 = vadd.f32 %v828_v31, %v810_v48 }
  0xd8   : > { %v847_v34 = vpop.f32.mrf.mxu2  ;;  %v811_v35 = vpop.f32.mrf.mxu0 }
  0xd9   : > { %v830_v36 = vpop.f32.mrf.mxu1  ;;  %v866_v44 = vpop.f32.mrf.mxu3  ;;  %v812_v50 = vadd.f32 %v1700_v43, %v811_v35  ;;  %v848_v55 = vadd.f32 %v847_v34, %v829_v49 }
  0xdb   : > { %v831_v56 = vadd.f32 %v830_v36, %v812_v50  ;;  %v867_v58 = vadd.f32 %v866_v44, %v848_v55 }
  0xe0   : > { %v849_v39 = vpop.f32.mrf.mxu2  ;;  %v814_v40 = vpop.f32.mrf.mxu0 }
  0xe1   : > { %v833_v41 = vpop.f32.mrf.mxu1  ;;  %v868_v54 = vpop.f32.mrf.mxu3  ;;  %v850_v57 = vadd.f32 %v849_v39, %v831_v56  ;;  %v815_v2 = vadd.f32 %v1700_v43, %v814_v40  ;;  %v1598_v39 = vld [vmem:[#allocation7 + $0x10] sm:$0xff]  ;;  %v1597_v40 = vld [vmem:[#allocation7 + $0x8] sm:$0xff] }
  0xe2   : > { %1105 = vmatpush.bf16.msra.mxu0 %v1598_v39  ;;  %1620 = vmatpush.bf16.msra.mxu1 %v1598_v39 }
  0xe3   : > { %v869_v61 = vadd.f32 %v868_v54, %v850_v57  ;;  %v834_v7 = vadd.f32 %v833_v41, %v815_v2  ;;  %v1596_v41 = vld [vmem:[#allocation7] sm:$0xff]  ;;  %v1702_v57 = vld [vmem:[%s2101_s6] ss:$0 sm:$0xff] }
  0xe6   : > { %1106 = vmatpush.bf16.msra.mxu0 %v1597_v40  ;;  %1621 = vmatpush.bf16.msra.mxu1 %v1597_v40 }
  0xe8   : > { %v852_v45 = vpop.f32.mrf.mxu2  ;;  %v816_v46 = vpop.f32.mrf.mxu0 }
  0xe9   : > { %v835_v47 = vpop.f32.mrf.mxu1  ;;  %v871_v4 = vpop.f32.mrf.mxu3  ;;  %v817_v8 = vadd.f32 %v1700_v43, %v816_v46  ;;  %v853_v15 = vadd.f32 %v852_v45, %v834_v7  ;;  %v1701_v43 = vld [vmem:[%s2099_s4] ss:$0 sm:$0xff] }
  0xea   : > { %1107 = vmatpush.bf16.msra.mxu0 %v1596_v41  ;;  %1622 = vmatpush.bf16.msra.mxu1 %v1596_v41 }
  0xeb   : > { %v836_v16 = vadd.f32 %v835_v47, %v817_v8  ;;  %v872_v23 = vadd.f32 %v871_v4, %v853_v15 }
  0xf0   : > { %v854_v51 = vpop.f32.mrf.mxu2  ;;  %v885_v52 = vpop.f32.mrf.mxu0 }
  0xf1   : > { %v904_v53 = vpop.f32.mrf.mxu1  ;;  %v886_v62 = vadd.f32 %v885_v52, %v867_v58  ;;  %v855_v20 = vadd.f32 %v854_v51, %v836_v16  ;;  %v873_v22 = vpop.f32.mrf.mxu3 }
  0xf3   : > { %v905_v5 = vadd.f32 %v904_v53, %v886_v62  ;;  %v874_v25 = vadd.f32 %v873_v22, %v855_v20 }
  0xf8   : > { %v923_v60 = vpop.f32.mrf.mxu2  ;;  %v887_v63 = vpop.f32.mrf.mxu0 }
  0xf9   : > { %v906_v1 = vpop.f32.mrf.mxu1  ;;  %v888_v3 = vadd.f32 %v887_v63, %v869_v61  ;;  %v924_v9 = vadd.f32 %v923_v60, %v905_v5 }
  0xfb   : > { %v907_v10 = vadd.f32 %v906_v1, %v888_v3  ;;  %v933_v17 = vmax.f32 %v924_v9, 0.0 }
 0x100   : > { %v925_v11 = vpop.f32.mrf.mxu2  ;;  %v890_v13 = vpop.f32.mrf.mxu0 }
 0x101   : > { %v926_v12 = vadd.f32 %v925_v11, %v907_v10  ;;  %v909_v19 = vpop.f32.mrf.mxu1  ;;  %v891_v26 = vadd.f32 %v890_v13, %v872_v23 }
 0x103   : > { %v934_v18 = vmax.f32 %v926_v12, 0.0  ;;  %v910_v29 = vadd.f32 %v909_v19, %v891_v26 }
 0x105   : > { %v937_v21 = vpack.c.bf16 %v934_v18, %v933_v17 }
 0x107   : > { %1015 = vmatmul.bf16.vlgmr.msrb.gmra.mxu3 %v937_v21 }
 0x108   : > { %v928_v24 = vpop.f32.mrf.mxu2  ;;  %v892_v27 = vpop.f32.mrf.mxu0 }
 0x109   : > { %v893_v28 = vadd.f32 %v892_v27, %v874_v25  ;;  %v911_v30 = vpop.f32.mrf.mxu1  ;;  %v929_v31 = vadd.f32 %v928_v24, %v910_v29 }
 0x10b   : > { %v912_v32 = vadd.f32 %v911_v30, %v893_v28  ;;  %v935_v35 = vmax.f32 %v929_v31, 0.0 }
 0x110   : > { %v930_v33 = vpop.f32.mrf.mxu2 }
 0x111   : > { %v931_v34 = vadd.f32 %v930_v33, %v912_v32 }
 0x113   : > { %v936_v36 = vmax.f32 %v931_v34, 0.0 }
 0x115   : > { %v938_v37 = vpack.c.bf16 %v936_v36, %v935_v35 }
 0x117   : > { %1020 = vmatmul.bf16.gmra.mxu3 %v938_v37 }
 0x18a   : > { %v1016_v42 = vpop.f32.mrf.mxu3 }
 0x18b   : > { %v1017_v44 = vadd.f32 %v1701_v43, %v1016_v42 }
 0x18d   : > { %v1026_v47 = vmax.f32 %v1017_v44, 0.0 }
 0x192   : > { %v1018_v45 = vpop.f32.mrf.mxu3 }
 0x193   : > { %v1019_v46 = vadd.f32 %v1701_v43, %v1018_v45 }
 0x195   : > { %v1027_v48 = vmax.f32 %v1019_v46, 0.0 }
 0x197   : > { %v1030_v49 = vpack.c.bf16 %v1027_v48, %v1026_v47 }
 0x199   : > { %1108 = vmatmul.bf16.vlgmr.msra.gmra.mxu0 %v1030_v49 }
 0x19a   : > { %v1021_v50 = vpop.f32.mrf.mxu3 }
 0x19b   : > { %v1022_v51 = vadd.f32 %v1701_v43, %v1021_v50 }
 0x19d   : > { %v1028_v54 = vmax.f32 %v1022_v51, 0.0 }
 0x1a2   : > { %v1023_v52 = vpop.f32.mrf.mxu3 }
 0x1a3   : > { %v1024_v53 = vadd.f32 %v1701_v43, %v1023_v52 }
 0x1a5   : > { %v1029_v55 = vmax.f32 %v1024_v53, 0.0 }
 0x1a7   : > { %v1031_v56 = vpack.c.bf16 %v1029_v55, %v1028_v54 }
 0x1a9   : > { %1113 = vmatmul.bf16.vlgmr.msra.gmra.mxu1 %v1031_v56 }
 0x216   : > { %v1109_v58 = vpop.f32.mrf.mxu0 }
 0x217   : > { %v1110_v59 = vadd.f32 %v1702_v57, %v1109_v58 }
 0x219   : > { %1119 = vmax.xlane.f32.xlu0 %v1110_v59 }
 0x21e   : > { %v1111_v60 = vpop.f32.mrf.mxu0 }
 0x21f   : > { %v1112_v61 = vadd.f32 %v1702_v57, %v1111_v60 }
 0x221   : > { %1121 = vmax.xlane.f32.xlu0 %v1112_v61 }
 0x226   : > { %v1114_v62 = vpop.f32.mrf.mxu1 }
 0x227   : > { %v1115_v63 = vadd.f32 %v1702_v57, %v1114_v62 }
 0x229   : > { %1123 = vmax.xlane.f32.xlu1 %v1115_v63 }
 0x22e   : > { %v1116_v0 = vpop.f32.mrf.mxu1 }
 0x22f   : > { %v1117_v1 = vadd.f32 %v1702_v57, %v1116_v0 }
 0x231   : > { %1125 = vmax.xlane.f32.xlu1 %v1117_v1 }
 0x28c   : > { %v1120_v2 = vpop.xlane.xlu0 %1119 }
 0x28d   : > { %v1127_v3 = vsub.f32 %v1110_v59, %v1120_v2 }
 0x28f   : > { %v1131_v4 = vmul.f32 1.442695, %v1127_v3 }
 0x291   : > { %1703 = vpow2.f32 %v1131_v4 }
 0x294   : > { %v1122_v5 = vpop.xlane.xlu0 %1121 }
 0x295   : > { %v1128_v6 = vsub.f32 %v1112_v61, %v1122_v5 }
 0x297   : > { %v1704_v7 = vpop.eup %1703  ;;  %v1133_v8 = vmul.f32 1.442695, %v1128_v6 }
 0x298   : > { %1139 = vadd.xlane.f32.xlu2 %v1704_v7 }
 0x299   : > { %1705 = vpow2.f32 %v1133_v8 }
 0x29c   : > { %v1124_v9 = vpop.xlane.xlu1 %1123 }
 0x29d   : > { %v1129_v10 = vsub.f32 %v1115_v63, %v1124_v9 }
 0x29f   : > { %v1706_v11 = vpop.eup %1705  ;;  %v1135_v12 = vmul.f32 1.442695, %v1129_v10 }
 0x2a0   : > { %1141 = vadd.xlane.f32.xlu2 %v1706_v11 }
 0x2a1   : > { %1707 = vpow2.f32 %v1135_v12 }
 0x2a4   : > { %v1126_v13 = vpop.xlane.xlu1 %1125 }
 0x2a5   : > { %v1130_v14 = vsub.f32 %v1117_v1, %v1126_v13 }
 0x2a7   : > { %v1708_v15 = vpop.eup %1707  ;;  %v1137_v16 = vmul.f32 1.442695, %v1130_v14 }
 0x2a8   : > { %1143 = vadd.xlane.f32.xlu0 %v1708_v15 }
 0x2a9   : > { %1709 = vpow2.f32 %v1137_v16 }
 0x2af   : > { %v1710_v17 = vpop.eup %1709 }
 0x2b0   : > { %1145 = vadd.xlane.f32.xlu1 %v1710_v17 }
 0x30b   : > { %v1140_v18 = vpop.xlane.xlu2 %1139 }
 0x30c   : > { %1711 = vrcp.f32 %v1140_v18 }
 0x312   : > { %v1712_v20 = vpop.eup %1711 }
 0x313   : > { %v1142_v19 = vpop.xlane.xlu2 %1141  ;;  %v1151_v22 = vmul.f32 %v1712_v20, %v1704_v7 }
 0x314   : > { %1713 = vrcp.f32 %v1142_v19 }
 0x31a   : > { %v1714_v21 = vpop.eup %1713 }
 0x31b   : > { %v1152_v23 = vmul.f32 %v1714_v21, %v1706_v11  ;;  %v1144_v25 = vpop.xlane.xlu0 %1143 }
 0x31c   : > { %1715 = vrcp.f32 %v1144_v25 }
 0x31d   : > { %v1607_v24 = vpack.c.bf16 %v1152_v23, %v1151_v22 }
 0x31f   : > { %1608 = vst [vmem:[%s352_s20] sm:$0xff] %v1607_v24  }
 0x322   : > { %v1716_v27 = vpop.eup %1715 }
 0x323   : > { %v1146_v26 = vpop.xlane.xlu1 %1145  ;;  %v1153_v29 = vmul.f32 %v1716_v27, %v1708_v15 }
 0x324   : > { %1717 = vrcp.f32 %v1146_v26 }
 0x32a   : > { %v1718_v28 = vpop.eup %1717 }
 0x32b   : > { %v1154_v30 = vmul.f32 %v1718_v28, %v1710_v17 }
 0x32d   : > { %v1612_v31 = vpack.c.bf16 %v1154_v30, %v1153_v29 }
 0x32f   : > { %1614 = vst [vmem:[%s352_s20 + $0x8] sm:$0xff] %v1612_v31  }
 0x330 PF: > { %p19_p4 = scmp.ge.s32.totalorder %s1990_s12, 4   ;;  %s2110_s24 = smov %s1873_s25 }
 0x331   : > { %s2111_s25 = smov %s1877_s26  ;;  %s2112_s26 = smov %s2002_s15 }
 0x332   : > { %s2113_s27 = smov %s1990_s12  ;;  %21 = sbr.rel (!%p19_p4) target bundleno = 5 (0x5), region = 100 }
 0x337   :  { %1185 = vsyncpa [#allocation3], 1 }
 0x338   :  { %1187 = vsyncpa [#allocation3 + $0x1], 1 }
 0x339   :  { %1188 = vsyncpa [#allocation5], 1 }
 0x33a   :  { %1189 = vsyncpa [#allocation8], 1 }

</bundles_post_ra>
